<compile_context>
chip_gen: v7x
topology: tpu7x:2x2x1
jax: 0.10.0
libtpu: 0.0.40
codegen_flags: <defaults>
</compile_context>

<pallas_src>
import functools
import numpy as np
import jax
import jax.numpy as jnp
from jax import lax
from jax.experimental import pallas as pl
from jax.experimental.pallas import tpu as pltpu


# ---------------------------------------------------------------------------
# Stage 1: K / V projections as full-width (TM, D) @ (D, D) GEMMs, written out
# head-major (B, H, S, d_k) so stage 2 never slices K/V column windows.
# grid = (B, S // TM); both axes "parallel".
# ---------------------------------------------------------------------------
def _kv_proj_kernel(k_ref, v_ref, wk_ref, bk_ref, wv_ref, bv_ref,
                    kh_ref, vh_ref, *, H, d_k, compute_dtype):
    k = k_ref[0].astype(compute_dtype)                                # (TM, D)
    v = v_ref[0].astype(compute_dtype)
    kp = (jnp.dot(k, wk_ref[...], preferred_element_type=jnp.float32)
          + bk_ref[...]).astype(compute_dtype)                        # (TM, D)
    vp = (jnp.dot(v, wv_ref[...], preferred_element_type=jnp.float32)
          + bv_ref[...]).astype(compute_dtype)
    # Head-major scatter: one static lane-slice + store per head.  Done once
    # here and reused by every query block in stage 2.
    for h in range(H):
        kh_ref[0, h] = kp[:, h * d_k:(h + 1) * d_k]
        vh_ref[0, h] = vp[:, h * d_k:(h + 1) * d_k]


# ---------------------------------------------------------------------------
# Stage 2: fused Q projection + masked softmax attention (all heads per grid
# step) + output projection + bias + residual.
# grid = (B, S // TQ); both axes "parallel".
# ---------------------------------------------------------------------------
def _attn_out_kernel(q_ref, kh_ref, vh_ref, bias_ref,
                     wq_ref, bq_ref, wo_ref, bo_ref,
                     out_ref, *maybe_attnw, H, d_k, compute_dtype):
    attnw_ref = maybe_attnw[0] if maybe_attnw else None
    scale = jnp.float32(1.0 / np.sqrt(d_k))

    q_res = q_ref[0]                                                  # (TQ, D) f32
    # Full-width Q projection (single MXU GEMM); fold 1/sqrt(d_k) into qp.
    qp = (jnp.dot(q_res.astype(compute_dtype), wq_ref[...],
                  preferred_element_type=jnp.float32) + bq_ref[...]) * scale
    bias = bias_ref[0].astype(jnp.float32)                            # (TQ, S)

    ctx_parts = []
    for h in range(H):                                                # static unroll
        qh = qp[:, h * d_k:(h + 1) * d_k].astype(compute_dtype)       # (TQ, d_k)
        kh = kh_ref[0, h]                                             # (S, d_k)
        # scores = qh @ kh^T (contract last dims -> no materialized transpose)
        s = lax.dot_general(qh, kh, (((1,), (1,)), ((), ())),
                            preferred_element_type=jnp.float32)       # (TQ, S)
        s = s + bias                                                  # additive mask
        m = jnp.max(s, axis=-1, keepdims=True)
        e = jnp.exp(s - m)
        den = jnp.sum(e, axis=-1, keepdims=True)
        inv = pl.reciprocal(den, approx=True)
        inv = inv * (2.0 - den * inv)          # Newton step -> ~f32 accuracy
        w = e * inv                                                   # (TQ, S)
        if attnw_ref is not None:
            attnw_ref[0, h] = w.astype(attnw_ref.dtype)
        ctx_parts.append(jnp.dot(w.astype(compute_dtype), vh_ref[0, h],
                                 preferred_element_type=jnp.float32))  # (TQ, d_k)

    ctx = jnp.concatenate(ctx_parts, axis=-1)                         # (TQ, D) f32
    # Output projection: single full-width GEMM + bias + residual.
    out = (jnp.dot(ctx.astype(compute_dtype), wo_ref[...],
                   preferred_element_type=jnp.float32)
           + bo_ref[...] + q_res)
    out_ref[0] = out.astype(out_ref.dtype)


# ---------------------------------------------------------------------------
# Tiling helpers.
# ---------------------------------------------------------------------------
def _pick_block(S, target):
    """Largest block <= target dividing S, preferring 256/128 multiples, then 16/8."""
    if S <= target:
        return S
    for step in (256, 128, 16, 8):
        t = (target // step) * step
        while t >= step:
            if S % t == 0:
                return t
            t -= step
    # TODO(synk): ragged sequence lengths with no sublane-friendly divisor are
    # not tiled; they fall back to a single full-S block.
    return S


def _vmem_budget_bytes():
    try:
        cap = int(pltpu.get_tpu_info().vmem_capacity_bytes)
    except Exception:
        cap = 64 * 1024 * 1024            # conservative (v7x per-TC VMEM)
    return min((cap * 3) // 4, 100 * 1024 * 1024)


def _choose_tq(S, D, H, target, budget, cdt_bytes, w_bytes, emit_weights):
    """Shrink the query block until the stage-2 per-step VMEM estimate fits."""
    def est(t):
        kv = 2 * S * D * cdt_bytes * 2             # head-major K, V blocks
        wts = 2 * D * D * cdt_bytes                # WQ, WO (grid-invariant)
        qio = 2 * t * D * 4 * 2                    # Q tile + output tile
        msk = t * S * 2 * 2                        # bf16 mask bias tile
        aw = (H * t * S * w_bytes * 2) if emit_weights else 0
        tmp = 6 * t * S * 4                        # in-kernel score temporaries
        return kv + wts + qio + msk + aw + tmp

    tq = _pick_block(S, target)
    while tq > 8 and est(tq) > budget:
        smaller = _pick_block(S, max(8, tq // 2))
        if smaller >= tq:
            break
        tq = smaller
    return tq


# ---------------------------------------------------------------------------
# Wrapper.
# ---------------------------------------------------------------------------
def multi_head_attention(Q, K, V, attn_mask, params, *, n_heads,
                         compute_dtype=jnp.float32,
                         weights_dtype=jnp.float32,
                         return_weights=True,
                         q_block=512):
    """Pallas-TPU forward of the PyTorch MultiHeadAttention module."""
    B, S, D = Q.shape
    H = n_heads
    d_k = D // H
    wq, bq, wk, bk, wv, bv, wo, bo = params

    cdt = compute_dtype
    wq_c, wk_c, wv_c, wo_c = (w.astype(cdt) for w in (wq, wk, wv, wo))
    bq2, bk2, bv2, bo2 = (b.reshape(1, D).astype(jnp.float32)
                          for b in (bq, bk, bv, bo))

    # Additive mask bias (0 keep / -1e9 masked) in bf16: halves the O(S^2) mask
    # HBM stream and turns masked_fill into a single VPU add.  exp underflows
    # to 0 for masked entries exactly like masked_fill_(-1e9).
    mask_bias = jnp.where(attn_mask.astype(jnp.bool_),
                          jnp.float32(-1e9),
                          jnp.float32(0.0)).astype(jnp.bfloat16)

    budget = _vmem_budget_bytes()
    TQ = _choose_tq(S, D, H, q_block, budget,
                    jnp.dtype(cdt).itemsize, jnp.dtype(weights_dtype).itemsize,
                    return_weights)
    NQ = S // TQ

    # ----------------- stage 1: K / V projections (head-major) --------------
    kh, vh = pl.pallas_call(
        functools.partial(_kv_proj_kernel, H=H, d_k=d_k, compute_dtype=cdt),
        grid_spec=pltpu.PrefetchScalarGridSpec(
            num_scalar_prefetch=0,
            grid=(B, NQ),
            in_specs=[
                pl.BlockSpec((1, TQ, D), lambda b, i: (b, i, 0)),     # K tile
                pl.BlockSpec((1, TQ, D), lambda b, i: (b, i, 0)),     # V tile
                pl.BlockSpec((D, D), lambda b, i: (0, 0)),            # WK
                pl.BlockSpec((1, D), lambda b, i: (0, 0)),            # bK
                pl.BlockSpec((D, D), lambda b, i: (0, 0)),            # WV
                pl.BlockSpec((1, D), lambda b, i: (0, 0)),            # bV
            ],
            out_specs=[
                pl.BlockSpec((1, H, TQ, d_k), lambda b, i: (b, 0, i, 0)),
                pl.BlockSpec((1, H, TQ, d_k), lambda b, i: (b, 0, i, 0)),
            ],
        ),
        out_shape=(jax.ShapeDtypeStruct((B, H, S, d_k), cdt),
                   jax.ShapeDtypeStruct((B, H, S, d_k), cdt)),
        compiler_params=pltpu.CompilerParams(
            dimension_semantics=("parallel", "parallel"),
            vmem_limit_bytes=budget),
    )(K, V, wk_c, bk2, wv_c, bv2)

    # ------- stage 2: Q proj + attention (all heads) + output proj ----------
    if return_weights:
        out_shape = (jax.ShapeDtypeStruct((B, S, D), jnp.float32),
                     jax.ShapeDtypeStruct((B, H, S, S), weights_dtype))
        out_specs = [pl.BlockSpec((1, TQ, D), lambda b, i: (b, i, 0)),
                     pl.BlockSpec((1, H, TQ, S), lambda b, i: (b, 0, i, 0))]
    else:
        out_shape = jax.ShapeDtypeStruct((B, S, D), jnp.float32)
        out_specs = pl.BlockSpec((1, TQ, D), lambda b, i: (b, i, 0))

    res = pl.pallas_call(
        functools.partial(_attn_out_kernel, H=H, d_k=d_k, compute_dtype=cdt),
        grid_spec=pltpu.PrefetchScalarGridSpec(
            num_scalar_prefetch=0,
            grid=(B, NQ),
            in_specs=[
                pl.BlockSpec((1, TQ, D), lambda b, i: (b, i, 0)),         # Q (proj + residual)
                pl.BlockSpec((1, H, S, d_k), lambda b, i: (b, 0, 0, 0)),  # K heads
                pl.BlockSpec((1, H, S, d_k), lambda b, i: (b, 0, 0, 0)),  # V heads
                pl.BlockSpec((1, TQ, S), lambda b, i: (b, i, 0)),         # mask bias
                pl.BlockSpec((D, D), lambda b, i: (0, 0)),                # WQ
                pl.BlockSpec((1, D), lambda b, i: (0, 0)),                # bQ
                pl.BlockSpec((D, D), lambda b, i: (0, 0)),                # WO
                pl.BlockSpec((1, D), lambda b, i: (0, 0)),                # bO
            ],
            out_specs=out_specs,
        ),
        out_shape=out_shape,
        compiler_params=pltpu.CompilerParams(
            dimension_semantics=("parallel", "parallel"),
            vmem_limit_bytes=budget),
    )(Q, kh, vh, mask_bias, wq_c, bq2, wo_c, bo2)

    if return_weights:
        output, attn_weights = res
        return output, attn_weights
    return res, None


def _reference(Q, K, V, mask, params, n_heads):
    """Pure-JAX f32 reference mirroring the PyTorch forward (dropout = id)."""
    wq, bq, wk, bk, wv, bv, wo, bo = params
    B, S, D = Q.shape
    d_k = D // n_heads

    def split(x):  # (B,S,D) -> (B,H,S,d_k)
        return x.reshape(B, S, n_heads, d_k).transpose(0, 2, 1, 3)

    qh = split(Q @ wq + bq)
    kh = split(K @ wk + bk)
    vh = split(V @ wv + bv)
    scores = jnp.einsum("bhqd,bhkd->bhqk", qh, kh) / np.sqrt(d_k)
    scores = jnp.where(mask[:, None, :, :], -1.0e9, scores)
    w = jax.nn.softmax(scores, axis=-1)
    attn = jnp.einsum("bhqk,bhkd->bhqd", w, vh)
    attn = attn.transpose(0, 2, 1, 3).reshape(B, S, D)
    out = attn @ wo + bo + Q
    return out, w


if __name__ == "__main__":
    B, S, D, H = 2, 8, 32, 4

    key = jax.random.PRNGKey(0)
    ks = jax.random.split(key, 12)
    wscale = 0.1
    Q = jax.random.normal(ks[0], (B, S, D), jnp.float32)
    K = jax.random.normal(ks[1], (B, S, D), jnp.float32)
    V = jax.random.normal(ks[2], (B, S, D), jnp.float32)

    # causal-style mask: True => masked (matches masked_fill_ semantics)
    mask_bool = jnp.triu(jnp.ones((S, S), jnp.bool_), k=1)
    attn_mask = jnp.broadcast_to(mask_bool, (B, S, S))

    params = (
        wscale * jax.random.normal(ks[3], (D, D), jnp.float32),   # WQ (in,out)
        wscale * jax.random.normal(ks[4], (D,), jnp.float32),     # bQ
        wscale * jax.random.normal(ks[5], (D, D), jnp.float32),   # WK
        wscale * jax.random.normal(ks[6], (D,), jnp.float32),     # bK
        wscale * jax.random.normal(ks[7], (D, D), jnp.float32),   # WV
        wscale * jax.random.normal(ks[8], (D,), jnp.float32),     # bV
        wscale * jax.random.normal(ks[9], (D, D), jnp.float32),   # WO (in,out)
        wscale * jax.random.normal(ks[10], (D,), jnp.float32),    # bO
    )

    ref_out, ref_w = _reference(Q, K, V, attn_mask, params, H)

    # f32 path: tight tolerance (covers approx-reciprocal + bf16 mask bias).
    out, attn_w = multi_head_attention(Q, K, V, attn_mask, params, n_heads=H,
                                       compute_dtype=jnp.float32)
    out = jax.block_until_ready(out)
    attn_w = jax.block_until_ready(attn_w)
    np.testing.assert_allclose(np.asarray(out), np.asarray(ref_out),
                               rtol=1e-3, atol=1e-3)
    np.testing.assert_allclose(np.asarray(attn_w), np.asarray(ref_w),
                               rtol=1e-3, atol=1e-3)

    # weights-skipping variant (removes the O(S^2) attn_weights writeback).
    out_nw, _ = multi_head_attention(Q, K, V, attn_mask, params, n_heads=H,
                                     compute_dtype=jnp.float32,
                                     return_weights=False)
    out_nw = jax.block_until_ready(out_nw)
    np.testing.assert_allclose(np.asarray(out_nw), np.asarray(ref_out),
                               rtol=1e-3, atol=1e-3)

    # bf16 MXU fast path with bf16 attn_weights emission, loose tolerance.
    out16, w16 = multi_head_attention(Q, K, V, attn_mask, params, n_heads=H,
                                      compute_dtype=jnp.bfloat16,
                                      weights_dtype=jnp.bfloat16)
    out16 = jax.block_until_ready(out16)
    w16 = jax.block_until_ready(w16)
    np.testing.assert_allclose(np.asarray(out16), np.asarray(ref_out),
                               rtol=5e-2, atol=5e-2)
    np.testing.assert_allclose(np.asarray(w16.astype(jnp.float32)),
                               np.asarray(ref_w), rtol=5e-2, atol=5e-2)

    print("KERNEL_OK")
</pallas_src>

<mosaic_0001>
module attributes {stable_mosaic.version = 11 : i64} {
  func.func @_kv_proj_kernel(%arg0: i32, %arg1: i32, %arg2: memref<1x8x32xf32, #tpu.memory_space<vmem>>, %arg3: memref<1x8x32xf32, #tpu.memory_space<vmem>>, %arg4: memref<32x32xf32, #tpu.memory_space<vmem>>, %arg5: memref<1x32xf32, #tpu.memory_space<vmem>>, %arg6: memref<32x32xf32, #tpu.memory_space<vmem>>, %arg7: memref<1x32xf32, #tpu.memory_space<vmem>>, %arg8: memref<1x4x8x8xf32, #tpu.memory_space<vmem>>, %arg9: memref<1x4x8x8xf32, #tpu.memory_space<vmem>>) attributes {dimension_semantics = [#tpu.dimension_semantics<parallel>, #tpu.dimension_semantics<parallel>], iteration_bounds = array<i64: 2, 1>, scalar_prefetch = 0 : i64, scratch_operands = 0 : i64, tpu.core_type = #tpu.core_type<tc>, window_params = [{transform_indices = @transform_0, window_bounds = array<i64: 1, 8, 32>}, {transform_indices = @transform_1, window_bounds = array<i64: 1, 8, 32>}, {pipeline_mode = #tpu.pipeline_mode<synchronous>, transform_indices = @transform_2, window_bounds = array<i64: 32, 32>}, {pipeline_mode = #tpu.pipeline_mode<synchronous>, transform_indices = @transform_3, window_bounds = array<i64: 1, 32>}, {pipeline_mode = #tpu.pipeline_mode<synchronous>, transform_indices = @transform_4, window_bounds = array<i64: 32, 32>}, {pipeline_mode = #tpu.pipeline_mode<synchronous>, transform_indices = @transform_5, window_bounds = array<i64: 1, 32>}, {transform_indices = @transform_6, window_bounds = array<i64: 1, 4, 8, 8>}, {transform_indices = @transform_7, window_bounds = array<i64: 1, 4, 8, 8>}]} {
    %c0 = arith.constant 0 : index
    %c0_0 = arith.constant 0 : index
    %c0_1 = arith.constant 0 : index
    %0 = vector.load %arg2[%c0, %c0_0, %c0_1] : memref<1x8x32xf32, #tpu.memory_space<vmem>>, vector<1x8x32xf32>
    %1 = vector.shape_cast %0 : vector<1x8x32xf32> to vector<8x32xf32>
    %c0_2 = arith.constant 0 : index
    %c0_3 = arith.constant 0 : index
    %c0_4 = arith.constant 0 : index
    %2 = vector.load %arg3[%c0_2, %c0_3, %c0_4] : memref<1x8x32xf32, #tpu.memory_space<vmem>>, vector<1x8x32xf32>
    %3 = vector.shape_cast %2 : vector<1x8x32xf32> to vector<8x32xf32>
    %c0_5 = arith.constant 0 : index
    %c0_6 = arith.constant 0 : index
    %4 = vector.load %arg4[%c0_5, %c0_6] : memref<32x32xf32, #tpu.memory_space<vmem>>, vector<32x32xf32>
    %cst = arith.constant dense<0.000000e+00> : vector<8x32xf32>
    %5 = tpu.matmul %1, %4, %cst {dimension_numbers = #tpu.dot_dimension_numbers<[1], [0], [0], [1], [0, 0, 1, 1], [], []>} : vector<8x32xf32>, vector<32x32xf32>, vector<8x32xf32> -> vector<8x32xf32>
    %c0_7 = arith.constant 0 : index
    %c0_8 = arith.constant 0 : index
    %6 = vector.load %arg5[%c0_7, %c0_8] : memref<1x32xf32, #tpu.memory_space<vmem>>, vector<1x32xf32>
    %7 = vector.broadcast %6 : vector<1x32xf32> to vector<8x32xf32>
    %8 = arith.addf %5, %7 : vector<8x32xf32>
    %c0_9 = arith.constant 0 : index
    %c0_10 = arith.constant 0 : index
    %9 = vector.load %arg6[%c0_9, %c0_10] : memref<32x32xf32, #tpu.memory_space<vmem>>, vector<32x32xf32>
    %cst_11 = arith.constant dense<0.000000e+00> : vector<8x32xf32>
    %10 = tpu.matmul %3, %9, %cst_11 {dimension_numbers = #tpu.dot_dimension_numbers<[1], [0], [0], [1], [0, 0, 1, 1], [], []>} : vector<8x32xf32>, vector<32x32xf32>, vector<8x32xf32> -> vector<8x32xf32>
    %c0_12 = arith.constant 0 : index
    %c0_13 = arith.constant 0 : index
    %11 = vector.load %arg7[%c0_12, %c0_13] : memref<1x32xf32, #tpu.memory_space<vmem>>, vector<1x32xf32>
    %12 = vector.broadcast %11 : vector<1x32xf32> to vector<8x32xf32>
    %13 = arith.addf %10, %12 : vector<8x32xf32>
    %14 = vector.extract_strided_slice %8 {offsets = [0, 0], sizes = [8, 8], strides = [1, 1]} : vector<8x32xf32> to vector<8x8xf32>
    %c0_14 = arith.constant 0 : index
    %c0_15 = arith.constant 0 : index
    %c0_16 = arith.constant 0 : index
    %c0_17 = arith.constant 0 : index
    %15 = vector.load %arg8[%c0_14, %c0_15, %c0_16, %c0_17] : memref<1x4x8x8xf32, #tpu.memory_space<vmem>>, vector<1x1x8x8xf32>
    %16 = vector.shape_cast %15 : vector<1x1x8x8xf32> to vector<8x8xf32>
    %17 = vector.shape_cast %14 : vector<8x8xf32> to vector<1x1x8x8xf32>
    tpu.vector_store %arg8[%c0_14, %c0_15, %c0_16, %c0_17], %17 {strides = array<i32>} : memref<1x4x8x8xf32, #tpu.memory_space<vmem>>, vector<1x1x8x8xf32>,
    %18 = vector.extract_strided_slice %13 {offsets = [0, 0], sizes = [8, 8], strides = [1, 1]} : vector<8x32xf32> to vector<8x8xf32>
    %c0_18 = arith.constant 0 : index
    %c0_19 = arith.constant 0 : index
    %c0_20 = arith.constant 0 : index
    %c0_21 = arith.constant 0 : index
    %19 = vector.load %arg9[%c0_18, %c0_19, %c0_20, %c0_21] : memref<1x4x8x8xf32, #tpu.memory_space<vmem>>, vector<1x1x8x8xf32>
    %20 = vector.shape_cast %19 : vector<1x1x8x8xf32> to vector<8x8xf32>
    %21 = vector.shape_cast %18 : vector<8x8xf32> to vector<1x1x8x8xf32>
    tpu.vector_store %arg9[%c0_18, %c0_19, %c0_20, %c0_21], %21 {strides = array<i32>} : memref<1x4x8x8xf32, #tpu.memory_space<vmem>>, vector<1x1x8x8xf32>,
    %22 = vector.extract_strided_slice %8 {offsets = [0, 8], sizes = [8, 8], strides = [1, 1]} : vector<8x32xf32> to vector<8x8xf32>
    %c0_22 = arith.constant 0 : index
    %c1 = arith.constant 1 : index
    %c0_23 = arith.constant 0 : index
    %c0_24 = arith.constant 0 : index
    %23 = vector.load %arg8[%c0_22, %c1, %c0_23, %c0_24] : memref<1x4x8x8xf32, #tpu.memory_space<vmem>>, vector<1x1x8x8xf32>
    %24 = vector.shape_cast %23 : vector<1x1x8x8xf32> to vector<8x8xf32>
    %25 = vector.shape_cast %22 : vector<8x8xf32> to vector<1x1x8x8xf32>
    tpu.vector_store %arg8[%c0_22, %c1, %c0_23, %c0_24], %25 {strides = array<i32>} : memref<1x4x8x8xf32, #tpu.memory_space<vmem>>, vector<1x1x8x8xf32>,
    %26 = vector.extract_strided_slice %13 {offsets = [0, 8], sizes = [8, 8], strides = [1, 1]} : vector<8x32xf32> to vector<8x8xf32>
    %c0_25 = arith.constant 0 : index
    %c1_26 = arith.constant 1 : index
    %c0_27 = arith.constant 0 : index
    %c0_28 = arith.constant 0 : index
    %27 = vector.load %arg9[%c0_25, %c1_26, %c0_27, %c0_28] : memref<1x4x8x8xf32, #tpu.memory_space<vmem>>, vector<1x1x8x8xf32>
    %28 = vector.shape_cast %27 : vector<1x1x8x8xf32> to vector<8x8xf32>
    %29 = vector.shape_cast %26 : vector<8x8xf32> to vector<1x1x8x8xf32>
    tpu.vector_store %arg9[%c0_25, %c1_26, %c0_27, %c0_28], %29 {strides = array<i32>} : memref<1x4x8x8xf32, #tpu.memory_space<vmem>>, vector<1x1x8x8xf32>,
    %30 = vector.extract_strided_slice %8 {offsets = [0, 16], sizes = [8, 8], strides = [1, 1]} : vector<8x32xf32> to vector<8x8xf32>
    %c0_29 = arith.constant 0 : index
    %c2 = arith.constant 2 : index
    %c0_30 = arith.constant 0 : index
    %c0_31 = arith.constant 0 : index
    %31 = vector.load %arg8[%c0_29, %c2, %c0_30, %c0_31] : memref<1x4x8x8xf32, #tpu.memory_space<vmem>>, vector<1x1x8x8xf32>
    %32 = vector.shape_cast %31 : vector<1x1x8x8xf32> to vector<8x8xf32>
    %33 = vector.shape_cast %30 : vector<8x8xf32> to vector<1x1x8x8xf32>
    tpu.vector_store %arg8[%c0_29, %c2, %c0_30, %c0_31], %33 {strides = array<i32>} : memref<1x4x8x8xf32, #tpu.memory_space<vmem>>, vector<1x1x8x8xf32>,
    %34 = vector.extract_strided_slice %13 {offsets = [0, 16], sizes = [8, 8], strides = [1, 1]} : vector<8x32xf32> to vector<8x8xf32>
    %c0_32 = arith.constant 0 : index
    %c2_33 = arith.constant 2 : index
    %c0_34 = arith.constant 0 : index
    %c0_35 = arith.constant 0 : index
    %35 = vector.load %arg9[%c0_32, %c2_33, %c0_34, %c0_35] : memref<1x4x8x8xf32, #tpu.memory_space<vmem>>, vector<1x1x8x8xf32>
    %36 = vector.shape_cast %35 : vector<1x1x8x8xf32> to vector<8x8xf32>
    %37 = vector.shape_cast %34 : vector<8x8xf32> to vector<1x1x8x8xf32>
    tpu.vector_store %arg9[%c0_32, %c2_33, %c0_34, %c0_35], %37 {strides = array<i32>} : memref<1x4x8x8xf32, #tpu.memory_space<vmem>>, vector<1x1x8x8xf32>,
    %38 = vector.extract_strided_slice %8 {offsets = [0, 24], sizes = [8, 8], strides = [1, 1]} : vector<8x32xf32> to vector<8x8xf32>
    %c0_36 = arith.constant 0 : index
    %c3 = arith.constant 3 : index
    %c0_37 = arith.constant 0 : index
    %c0_38 = arith.constant 0 : index
    %39 = vector.load %arg8[%c0_36, %c3, %c0_37, %c0_38] : memref<1x4x8x8xf32, #tpu.memory_space<vmem>>, vector<1x1x8x8xf32>
    %40 = vector.shape_cast %39 : vector<1x1x8x8xf32> to vector<8x8xf32>
    %41 = vector.shape_cast %38 : vector<8x8xf32> to vector<1x1x8x8xf32>
    tpu.vector_store %arg8[%c0_36, %c3, %c0_37, %c0_38], %41 {strides = array<i32>} : memref<1x4x8x8xf32, #tpu.memory_space<vmem>>, vector<1x1x8x8xf32>,
    %42 = vector.extract_strided_slice %13 {offsets = [0, 24], sizes = [8, 8], strides = [1, 1]} : vector<8x32xf32> to vector<8x8xf32>
    %c0_39 = arith.constant 0 : index
    %c3_40 = arith.constant 3 : index
    %c0_41 = arith.constant 0 : index
    %c0_42 = arith.constant 0 : index
    %43 = vector.load %arg9[%c0_39, %c3_40, %c0_41, %c0_42] : memref<1x4x8x8xf32, #tpu.memory_space<vmem>>, vector<1x1x8x8xf32>
    %44 = vector.shape_cast %43 : vector<1x1x8x8xf32> to vector<8x8xf32>
    %45 = vector.shape_cast %42 : vector<8x8xf32> to vector<1x1x8x8xf32>
    tpu.vector_store %arg9[%c0_39, %c3_40, %c0_41, %c0_42], %45 {strides = array<i32>} : memref<1x4x8x8xf32, #tpu.memory_space<vmem>>, vector<1x1x8x8xf32>,
    return
  }
  func.func @transform_0(%arg0: i32, %arg1: i32) -> (i32, i32, i32) {
    %c0_i32 = arith.constant 0 : i32
    %c0_i32_0 = arith.constant 0 : i32
    return %arg0, %arg1, %c0_i32 : i32, i32, i32
  }
  func.func @transform_1(%arg0: i32, %arg1: i32) -> (i32, i32, i32) {
    %c0_i32 = arith.constant 0 : i32
    %c0_i32_0 = arith.constant 0 : i32
    return %arg0, %arg1, %c0_i32 : i32, i32, i32
  }
  func.func @transform_2(%arg0: i32, %arg1: i32) -> (i32, i32) {
    %c0_i32 = arith.constant 0 : i32
    %c0_i32_0 = arith.constant 0 : i32
    %c0_i32_1 = arith.constant 0 : i32
    return %c0_i32, %c0_i32_0 : i32, i32
  }
  func.func @transform_3(%arg0: i32, %arg1: i32) -> (i32, i32) {
    %c0_i32 = arith.constant 0 : i32
    %c0_i32_0 = arith.constant 0 : i32
    %c0_i32_1 = arith.constant 0 : i32
    return %c0_i32, %c0_i32_0 : i32, i32
  }
  func.func @transform_4(%arg0: i32, %arg1: i32) -> (i32, i32) {
    %c0_i32 = arith.constant 0 : i32
    %c0_i32_0 = arith.constant 0 : i32
    %c0_i32_1 = arith.constant 0 : i32
    return %c0_i32, %c0_i32_0 : i32, i32
  }
  func.func @transform_5(%arg0: i32, %arg1: i32) -> (i32, i32) {
    %c0_i32 = arith.constant 0 : i32
    %c0_i32_0 = arith.constant 0 : i32
    %c0_i32_1 = arith.constant 0 : i32
    return %c0_i32, %c0_i32_0 : i32, i32
  }
  func.func @transform_6(%arg0: i32, %arg1: i32) -> (i32, i32, i32, i32) {
    %c0_i32 = arith.constant 0 : i32
    %c0_i32_0 = arith.constant 0 : i32
    %c0_i32_1 = arith.constant 0 : i32
    return %arg0, %c0_i32, %arg1, %c0_i32_0 : i32, i32, i32, i32
  }
  func.func @transform_7(%arg0: i32, %arg1: i32) -> (i32, i32, i32, i32) {
    %c0_i32 = arith.constant 0 : i32
    %c0_i32_0 = arith.constant 0 : i32
    %c0_i32_1 = arith.constant 0 : i32
    return %arg0, %c0_i32, %arg1, %c0_i32_0 : i32, i32, i32, i32
  }
}

</mosaic_0001>

<bundles_post_ra>
// kernel: tpu_custom_call.1
= control target key start
LH: loop header
LB: loop body
LE: loop exit
PB: predicated region body
PF: predicated region fallthrough
CT: control target
= control target key end

     0   :  { %s1632_s0 = inlined_call_operand.hbm [shape: f32[2,8,32], index: 0, kind: input, shape index: {}]   ;;  %s1633_s1 = inlined_call_operand.hbm [shape: f32[2,8,32], index: 1, kind: input, shape index: {}]   ;;  %s1634_s2 = inlined_call_operand.hbm [shape: f32[32,32], index: 2, kind: input, shape index: {}]   ;;  %s1635_s3 = inlined_call_operand.vmem [shape: f32[1,32], index: 3, kind: input, shape index: {}]   ;;  %s1636_s4 = inlined_call_operand.hbm [shape: f32[32,32], index: 4, kind: input, shape index: {}]   ;;  %s1637_s5 = inlined_call_operand.vmem [shape: f32[1,32], index: 5, kind: input, shape index: {}]   ;;  %s1638_s6 = inlined_call_operand.hbm [shape: f32[2,4,8,8], index: 6, kind: output, shape index: {0}]   ;;  %s1639_s7 = inlined_call_operand.hbm [shape: f32[2,4,8,8], index: 7, kind: output, shape index: {1}]  }
   0x1   :  { %1647 = sst [smem:[#allocation23_spill]] %s1634_s2 }
   0x2   :  { %1648 = sst [smem:[#allocation24_spill]] %s1636_s4 }
   0x3   :  { %13 = vsyncpa [#allocation3], 0 }
   0x4   :  { %15 = vsyncpa [#allocation3 + $0x1], 0 }
   0x5   :  { %16 = vsyncpa [#allocation6], 0 }
   0x6   :  { %18 = vsyncpa [#allocation6 + $0x1], 0 }
   0x7   :  { %19 = vsyncpa [#allocation9], 0 }
   0x8   :  { %20 = vsyncpa [#allocation4], 0 }
   0x9   :  { %22 = vsyncpa [#allocation4 + $0x1], 0 }
   0xa   :  { %23 = vsyncpa [#allocation12], 0 }
   0xb   :  { %25 = vsyncpa [#allocation12 + $0x1], 0  ;;  %s1281_s24 = smov 0   ;;  %s1283_s25 = smov 0  }
   0xc   :  { %s1285_s26 = smov 0   ;;  %s1287_s27 = smov 0  }
   0xd   :  { %s1289_s28 = smov 0   ;;  %s1291_s29 = smov 0  }
   0xe LB: > { %1649 = sst [smem:[#allocation19_spill]] %s1219_s28  ;;  %s1312_s30 = sadd.s32 4294967295, %s1223_s29   ;;  %s1223_s29 = sphi %s1291_s29, %s31_s29   ;;  %s1219_s28 = sphi %s1289_s28, %s1674_s28   ;;  %s1215_s27 = sphi %s1287_s27, %s1673_s27   ;;  %s1211_s26 = sphi %s1285_s26, %s1677_s26   ;;  %s1207_s25 = sphi %s1283_s25, %s1676_s25   ;;  %s1203_s24 = sphi %s1281_s24, %s1675_s24  }
   0xf   : > { %s798_s8 = sadd.s32 4294967294, %s1223_s29   ;;  %p65_p0 = scmp.ne.s32.totalorder %s1207_s25, %s1203_s24 }
  0x10   : > { %p1640_p1 = scmp.eq.s32.totalorder %s1312_s30, 0  ;;  %p209_p3 = scmp.eq.s32.totalorder %s798_s8, 1 }
  0x11   : > { %p799_p5 = scmp.ge.s32.totalorder %s1223_s29, 1  ;;  %p244_p7 = scmp.lt.s32.totalorder %s1223_s29, 3 }
  0x12   : > { %p1321_p4 = por %p1640_p1, %p65_p0  ;;  %p1326_p6 = por %p209_p3, %p65_p0 }
  0x13   : > { %p1331_p8 = pnand %p799_p5, %p244_p7  ;;  %s1225_s12 = smov [#allocation7]  }
  0x14   : > { %s1650_s9 = scalar_select %p1321_p4, 1, 0 }
  0x15   : > { %s1651_s10 = scalar_select %p1326_p6, 1, 0 }
  0x16   : > { %s1653_s11 = scalar_select %p1331_p8, 1, 0 }
  0x17   : > { %1652 = sst [smem:[#allocation20_spill]] %s1651_s10  ;;  %s256_s13 = sshll.u32 %s1225_s12, 4  ;;  %s1335_s13 = int_to_ptr.vmem [resolvable:$true] %s256_s13 }
  0x18   : > { %p894_p9 = pneg %p1331_p8  ;;  %s1226_s15 = smov [#allocation8]  }
  0x19   : > { %s272_s16 = sshll.u32 %s1226_s15, 4  ;;  %s1655_s2 = sld [smem:[#allocation23_spill]]  ;;  %s1346_s16 = int_to_ptr.vmem [resolvable:$true] %s272_s16 }
  0x1a   : > { %p1342_p11 = pnand %p894_p9, %p1640_p1 }
  0x1c   : > { %p983_p13 = pneg %p1342_p11 }
  0x1f   : > { %s981_s19 = scalar_lea.hbm %s1655_s2, 512 }
  0x20   : > { %p982_p12 = scmp.ne.s32.totalorder %s1655_s2, %s981_s19  ;;  %p988_p5 = scmp.lt.u32.totalorder %s981_s19, %s1655_s2 }
  0x22   : > { %p984_p0 = pnand %p983_p13, %p982_p12 }
  0x24   : > { %p985_p3 = pneg %p984_p0 }
  0x26   : > { %p990_p7 = pnand %p988_p5, %p985_p3 }
  0x28   : > { %993 = shalt.err (!%p990_p7)
}
  0x29   : > { %s994_s8 = scalar_lea.vmem %s1335_s13, 512  ;;  %p1002_p2 = scmp.lt.s32.totalorder %s1335_s13, %s1335_s13 }
  0x2a   : > { %p995_p9 = scmp.ne.s32.totalorder %s1335_s13, %s994_s8  ;;  %p1003_p12 = scmp.lt.s32.totalorder %s994_s8, %s994_s8 }
  0x2c   : > { %p997_p10 = pnand %p995_p9, %p983_p13  ;;  %p1004_p0 = por %p1003_p12, %p1002_p2 }
  0x2e   : > { %p998_p1 = pneg %p997_p10 }
  0x30   : > { %p1005_p6 = pnand %p1004_p0, %p998_p1 }
  0x32   : > { %1008 = shalt.err (!%p1005_p6)
}
  0x33   : > { %s1227_s12 = smov 128   ;;  %s1228_s15 = smov 8  }
  0x34   : > { %897 = dma.hbm_to_vmem [thread:$0]  (!%p1342_p11), %s1655_s2, 512, %s1335_s13, [#allocation6], %s1227_s12, %s1227_s12, %s1228_s15  }
  0x35   : > { %s1656_s4 = sld [smem:[#allocation24_spill]] }
  0x3b   : > { %s1009_s21 = scalar_lea.hbm %s1656_s4, 512 }
  0x3c   : > { %p1010_p2 = scmp.ne.s32.totalorder %s1656_s4, %s1009_s21  ;;  %p1016_p10 = scmp.lt.u32.totalorder %s1009_s21, %s1656_s4 }
  0x3e   : > { %p1012_p1 = pnand %p1010_p2, %p983_p13 }
  0x40   : > { %p1013_p6 = pneg %p1012_p1 }
  0x42   : > { %p1018_p3 = pnand %p1016_p10, %p1013_p6 }
  0x44   : > { %1021 = shalt.err (!%p1018_p3)
}
  0x45   : > { %s1022_s13 = scalar_lea.vmem %s1346_s16, 512  ;;  %p1030_p12 = scmp.lt.s32.totalorder %s1346_s16, %s1346_s16 }
  0x46   : > { %p1023_p5 = scmp.ne.s32.totalorder %s1346_s16, %s1022_s13  ;;  %p1031_p0 = scmp.lt.s32.totalorder %s1022_s13, %s1022_s13 }
  0x48   : > { %p1025_p7 = pnand %p1023_p5, %p983_p13  ;;  %p1032_p2 = por %p1031_p0, %p1030_p12 }
  0x4a   : > { %p1026_p9 = pneg %p1025_p7 }
  0x4c   : > { %p1033_p1 = pnand %p1032_p2, %p1026_p9 }
  0x4e   : > { %1036 = shalt.err (!%p1033_p1)
}
  0x4f   : > { %900 = dma.hbm_to_vmem [thread:$0]  (!%p1342_p11), %s1656_s4, 512, %s1346_s16, [#allocation9], %s1227_s12, %s1227_s12, %s1228_s15  }
  0x50   : > { %s43_s18 = sadd.s32 1, %s1219_s28  ;;  %s52_s19 = sadd.s32 1, %s1211_s26 }
  0x51   : > { %p45_p13 = scmp.ge.s32.totalorder %s43_s18, 2  ;;  %p59_p6 = scmp.ne.s32.totalorder %s1211_s26, %s1207_s25 }
  0x52   : > { %p60_p10 = scmp.eq.s32.totalorder %s1223_s29, 0  ;;  %p917_p3 = scmp.lt.s32.totalorder %s1223_s29, 2 }
  0x53   : > { %s1679_s18 = smov (%p45_p13, %s43_s18), 0  ;;  %p1658_p7 = scmp.eq.s32.totalorder %s1312_s30, 1 }
  0x54   : > { %1657 = sst [smem:[#allocation21_spill]] %s1679_s18  ;;  %p61_p5 = por %p60_p10, %p59_p6 }
  0x55   : > { %p1410_p9 = por %p1658_p7, %p59_p6  ;;  %s47_s20 = ssub.s32 %s1219_s28, %s1679_s18 }
  0x56   : > { %s289_s21 = sand.u32 1, %s1211_s26   ;;  %p50_p12 = scmp.eq.s32.totalorder %s47_s20, 0 }
  0x57   : > { %s1659_s14 = scalar_select %p1410_p9, 1, 0 }
  0x58   : > { %s1417_s16 = sshll.u32 %s289_s21, 3  ;;  %s804_s12 = sshll.u32 %s1219_s28, 7 }
  0x59   : > { %s1421_s15 = scalar_select %p50_p12, %s1211_s26, %s52_s19  }
  0x5a   : > { %s1426_s8 = scalar_lea.hbm %s1632_s0, %s804_s12  ;;  %s293_s13 = scalar_lea.vmem [#allocation2], %s1417_s16 }
  0x5b   : > { %1660 = sst [smem:[#allocation22_spill]] %s1421_s15  ;;  %s301_s10 = sshll.u32 %s293_s13, 4  ;;  %s1435_s10 = int_to_ptr.vmem [resolvable:$true] %s301_s10 }
  0x5c   : > { %p1431_p11 = pnand %p917_p3, %p61_p5  ;;  %s1440_s22 = scalar_lea.hbm %s1633_s1, %s804_s12 }
  0x5d   : > { %s290_s23 = scalar_lea.sflag [#allocation3], %s289_s21  ;;  %s1037_s2 = scalar_lea.hbm %s1426_s8, 128 }
  0x5e   : > { %p1038_p0 = scmp.ne.s32.totalorder %s1426_s8, %s1037_s2  ;;  %p1039_p2 = pneg %p1431_p11 }
  0x5f   : > { %s1042_s18 = scalar_lea.hbm %s1632_s0, 256  ;;  %p1043_p6 = scmp.lt.u32.totalorder %s1426_s8, %s1632_s0 }
  0x60   : > { %p1040_p1 = pnand %p1039_p2, %p1038_p0  ;;  %p1044_p10 = scmp.lt.u32.totalorder %s1042_s18, %s1037_s2 }
  0x61   : > { %p1046_p5 = scmp.lt.u32.totalorder %s1037_s2, %s1426_s8 }
  0x62   : > { %p1041_p13 = pneg %p1040_p1  ;;  %p1045_p3 = por %p1044_p10, %p1043_p6 }
  0x64   : > { %p1047_p7 = por %p1046_p5, %p1045_p3 }
  0x66   : > { %p1048_p12 = pnand %p1047_p7, %p1041_p13 }
  0x68   : > { %1051 = shalt.err (!%p1048_p12)
}
  0x69   : > { %s1052_s21 = scalar_lea.vmem %s1435_s10, 128  ;;  %s1229_s4 = smov [#allocation2]  }
  0x6a   : > { %p1053_p0 = scmp.ne.s32.totalorder %s1435_s10, %s1052_s21  ;;  %s1057_s12 = sshll.u32 %s1229_s4, 4  ;;  %s1058_s12 = int_to_ptr.vmem [resolvable:$false] %s1057_s12 }
  0x6b   : > { %s1059_s28 = scalar_lea.vmem %s1058_s12, 256  ;;  %p1060_p4 = scmp.lt.s32.totalorder %s1435_s10, %s1058_s12 }
  0x6c   : > { %p1055_p1 = pnand %p1053_p0, %p1039_p2  ;;  %p1061_p6 = scmp.lt.s32.totalorder %s1059_s28, %s1052_s21 }
  0x6e   : > { %p1056_p9 = pneg %p1055_p1  ;;  %p1062_p10 = por %p1061_p6, %p1060_p4 }
  0x70   : > { %p1063_p3 = pnand %p1062_p10, %p1056_p9 }
  0x72   : > { %1066 = shalt.err (!%p1063_p3)
}
  0x73   : > { %904 = dma.hbm_to_vmem [thread:$0]  (!%p1431_p11), %s1426_s8, 128, %s1435_s10, %s290_s23  }
  0x74   : > { %s308_s2 = sand.u32 1, %s1223_s29   ;;  %s312_s18 = scalar_lea.vmem [#allocation5], %s1417_s16 }
  0x75   : > { %s320_s15 = sshll.u32 %s312_s18, 4  ;;  %s309_s19 = scalar_lea.sflag [#allocation6], %s308_s2  ;;  %s321_s15 = int_to_ptr.vmem [resolvable:$true] %s320_s15 }
  0x76   : > { %s1067_s20 = scalar_lea.hbm %s1440_s22, 128  ;;  %s1072_s4 = scalar_lea.hbm %s1633_s1, 256 }
  0x77   : > { %p1068_p4 = scmp.ne.s32.totalorder %s1440_s22, %s1067_s20  ;;  %p1073_p5 = scmp.lt.u32.totalorder %s1440_s22, %s1633_s1 }
  0x78   : > { %p1074_p7 = scmp.lt.u32.totalorder %s1072_s4, %s1067_s20  ;;  %p1076_p0 = scmp.lt.u32.totalorder %s1067_s20, %s1440_s22 }
  0x79   : > { %p1070_p9 = pnand %p1068_p4, %p1039_p2 }
  0x7a   : > { %p1075_p12 = por %p1074_p7, %p1073_p5 }
  0x7b   : > { %p1071_p13 = pneg %p1070_p9 }
  0x7c   : > { %p1077_p1 = por %p1076_p0, %p1075_p12 }
  0x7e   : > { %p1078_p6 = pnand %p1077_p1, %p1071_p13 }
  0x80   : > { %1081 = shalt.err (!%p1078_p6)
}
  0x81   : > { %s1082_s16 = scalar_lea.vmem %s321_s15, 128  ;;  %s1230_s8 = smov [#allocation5]  }
  0x82   : > { %p1083_p10 = scmp.ne.s32.totalorder %s321_s15, %s1082_s16  ;;  %s1087_s10 = sshll.u32 %s1230_s8, 4  ;;  %s1088_s10 = int_to_ptr.vmem [resolvable:$false] %s1087_s10 }
  0x83   : > { %s1089_s23 = scalar_lea.vmem %s1088_s10, 256  ;;  %p1090_p9 = scmp.lt.s32.totalorder %s321_s15, %s1088_s10 }
  0x84   : > { %p1085_p3 = pnand %p1083_p10, %p1039_p2  ;;  %p1091_p8 = scmp.lt.s32.totalorder %s1089_s23, %s1082_s16 }
  0x86   : > { %p1086_p4 = pneg %p1085_p3  ;;  %p1092_p5 = por %p1091_p8, %p1090_p9 }
  0x88   : > { %p1093_p7 = pnand %p1092_p5, %p1086_p4 }
  0x8a   : > { %1096 = shalt.err (!%p1093_p7)
}
  0x8b   : > { %907 = dma.hbm_to_vmem [thread:$0]  (!%p1431_p11), %s1440_s22, 128, %s321_s15, %s309_s19  }
  0x8c   : > { %p1662_p13 = scmp.ne.s32.totalorder %s1653_s11, 0 }
  0x8d   : > { %s1491_s2 = sand.u32 (!%p1662_p13), 1, %s1207_s25   ;;  %p1663_p8 = scmp.ne.s32.totalorder (!%p1662_p13), %s1650_s9, 0 }
  0x8e   : > { %329 = sbr.rel (%p1662_p13) target bundleno = 546 (0x222), region = 44  ;;  %s808_s18 = sshll.u32 (!%p1662_p13), %s1491_s2, 3 }
  0x8f   : > { %s332_s20 = scalar_lea.sflag (!%p1662_p13), [#allocation3], %s1491_s2  ;;  %s1495_s13 = scalar_lea.vmem (!%p1662_p13), [#allocation2], %s808_s18 }
  0x95   : > { %1178 = dma.done.wait (%p1663_p8), %s332_s20, 128  }
  0x96   : > { %1180 = vsyncadd (%p1663_p8), %s332_s20, 4294967168  ;;  %s340_s17 = sand.u32 1, %s1312_s30   ;;  %s1502_s22 = scalar_lea.vmem [#allocation5], %s808_s18 }
  0x97   : > { %s341_s11 = scalar_lea.sflag [#allocation6], %s340_s17 }
  0x98   : > { %1182 = dma.done.wait (%p1663_p8), %s341_s11, 128  }
  0x99   : > { %1184 = vsyncadd (%p1663_p8), %s341_s11, 4294967168  ;;  %p1664_p11 = scmp.eq.s32.totalorder %s1312_s30, 0 }
  0x9b   : > { %1186 = dma.done.wait (%p1664_p11), [#allocation6], 512   ;;  %p1665_p2 = pmov %p1664_p11 }
  0x9d   : > { %1188 = vsyncadd (%p1665_p2), [#allocation6], 4294966784  ;;  %p1666_p12 = pmov %p1665_p2 }
  0x9e   : > { %p1667_p0 = pmov %p1665_p2 }
  0x9f   : > { %1190 = dma.done.wait (%p1666_p12), [#allocation9], 512  }
  0xa0   : > { %1192 = vsyncadd (%p1667_p0), [#allocation9], 4294966784  ;;  %v1231_v0 = vmov 0.0|0.0   ;;  %vm1232_vm0 = vmmov 0   ;;  %v1233_v1 = vmov 0.0   ;;  %v395_v2 = vld [vmem:[#allocation7] sm:$0xff] }
  0xa1   : > { %866 = vmatprep.subr.bf16.mxu0 %v1231_v0  ;;  %872 = vmatprep.subr.bf16.mxu1 %v1231_v0  ;;  %v396_v3 = vld [vmem:[#allocation7 + $0x8] sm:$0xff]  ;;  %v480_v4 = vld [vmem:[#allocation8] sm:$0xff]  ;;  %v397_v7 = vld [vmem:[#allocation7 + $0x10] sm:$0xff]  ;;  %vm406_vm1 = vcmask 261120   ;;  %s812_s30 = sshll.u32 %s1491_s2, 5  ;;  %vm564_vm2 = vcmask 64512  }
  0xa2   : > { %852 = vmatprep.mubr.msk.f32.mxu0 %vm1232_vm0, %v1233_v1  ;;  %863 = vmatprep.mubr.msk.f32.mxu1 %vm1232_vm0, %v1233_v1  ;;  %v867_v5 = vpack.c.bf16 %v396_v3, %v395_v2  ;;  %v481_v6 = vld [vmem:[#allocation8 + $0x8] sm:$0xff]  ;;  %v398_v8 = vld [vmem:[#allocation7 + $0x18] sm:$0xff]  ;;  %v482_v10 = vld [vmem:[#allocation8 + $0x10] sm:$0xff]  ;;  %s1525_s4 = scalar_lea.vmem [#allocation10], %s812_s30  ;;  %s1234_s12 = smov 112  }
  0xa3   : > { %v873_v9 = vpack.c.bf16 %v481_v6, %v480_v4  ;;  %v483_v11 = vld [vmem:[#allocation8 + $0x18] sm:$0xff]  ;;  %v870_v12 = vpack.c.bf16 %v398_v8, %v397_v7  ;;  %v393_v14 = vld [vmem:[%s1495_s13] sm:$0xff]  ;;  %s1235_s28 = smov 120   ;;  %s392_s16 = scalar_lea.vmem [#allocation11], %s812_s30 }
  0xa4   : > { %868 = vmatpush3.bf16.msra.mxu0 %v867_v5  ;;  %v876_v13 = vpack.c.bf16 %v483_v11, %v482_v10  ;;  %v394_v15 = vld [vmem:[%s1502_s22] sm:$0xff]  ;;  %v814_v16 = vld [vmem:[%s1635_s3] ss:$0 sm:$0xff]  ;;  %s1236_s8 = smov 104   ;;  %s619_s10 = sshll.u32 %s1525_s4, 4  ;;  %s1536_s10 = int_to_ptr.vmem [resolvable:$true] %s619_s10 }
  0xa5   : > { %869 = vmatprep.subr.bf16.mxu0 %v1231_v0  ;;  %874 = vmatpush3.bf16.msra.mxu1 %v873_v9  ;;  %v816_v17 = vld [vmem:[%s1637_s5] ss:$0 sm:$0xff]  ;;  %s636_s23 = sshll.u32 %s392_s16, 4  ;;  %s832_s18 = sshll.u32 %s1215_s27, 9  ;;  %s1538_s23 = int_to_ptr.vmem [resolvable:$true] %s636_s23 }
  0xa6   : > { %875 = vmatprep.subr.bf16.mxu1 %v1231_v0  ;;  %s1545_s17 = scalar_lea.hbm %s1638_s6, %s832_s18  ;;  %s1550_s22 = scalar_lea.hbm %s1639_s7, %s832_s18 }
  0xa7   : > { %s600_s30 = scalar_lea.sflag [#allocation4], %s1491_s2  ;;  %s1097_s9 = scalar_lea.vmem %s1536_s10, 512 }
  0xa8   : > { %871 = vmatpush3.bf16.msra.mxu0 %v870_v12  ;;  %p1098_p1 = scmp.ne.s32.totalorder %s1536_s10, %s1097_s9  ;;  %p1668_p6 = scmp.ne.s32.totalorder %s1659_s14, 0 }
  0xa9   : > { %877 = vmatpush3.bf16.msra.mxu1 %v876_v13  ;;  %s1237_s15 = smov [#allocation10]  }
  0xaa   : > { %p1099_p10 = pnand %p1098_p1, %p1668_p6  ;;  %s1101_s19 = sshll.u32 %s1237_s15, 4  ;;  %s1102_s19 = int_to_ptr.vmem [resolvable:$false] %s1101_s19 }
  0xab   : > { %853 = vmatmul.mubr.msk.f32.vlgmr.msra.gmra.mrb[0].mxu0 %vm406_vm1, %v393_v14  ;;  %s1103_s21 = scalar_lea.vmem %s1102_s19, 1024  ;;  %p1104_p4 = scmp.lt.s32.totalorder %s1536_s10, %s1102_s19 }
  0xac   : > { %864 = vmatmul.mubr.msk.f32.vlgmr.msra.gmra.mrb[0].mxu1 %vm406_vm1, %v394_v15  ;;  %p1100_p3 = pneg %p1099_p10  ;;  %p1105_p9 = scmp.lt.s32.totalorder %s1103_s21, %s1097_s9 }
  0xae   : > { %p1106_p5 = por %p1105_p9, %p1104_p4 }
  0xb0   : > { %p1107_p7 = pnand %p1106_p5, %p1100_p3 }
 0x17e   : > { %v476_v18 = vpop.f32.mrb[0].mxu0 }
 0x17f   : > { %v477_v19 = vadd.f32 %v814_v16, %v476_v18  ;;  %v854_v20 = vpop.f32.mrb[1].mxu0  ;;  %v560_v21 = vpop.f32.mrb[0].mxu1 }
 0x180   : > { %v561_v22 = vadd.f32 %v816_v17, %v560_v21  ;;  %v865_v23 = vpop.f32.mrb[1].mxu1 }
 0x181   : > { %565 = vst.msk [vmem:[%s1525_s4] sm:$0xff] %vm564_vm2, %v477_v19  ;;  %579 = vrot.lane.b32.xlu1 %v477_v19, %s1234_s12  ;;  %568 = vrot.lane.b32.xlu0 %v477_v19, %s1235_s28 }
 0x182   : > { %566 = vst.msk [vmem:[%s392_s16] sm:$0xff] %vm564_vm2, %v561_v22 }
 0x185   : > { %584 = vrot.lane.b32.xlu1 %v561_v22, %s1234_s12  ;;  %574 = vrot.lane.b32.xlu0 %v561_v22, %s1235_s28 }
 0x189   : > { %594 = vrot.lane.b32.xlu1 %v561_v22, %s1236_s8  ;;  %589 = vrot.lane.b32.xlu0 %v477_v19, %s1236_s8 }
 0x1f3   : > { %v580_v24 = vpop.permute.xlu1 %579  ;;  %v569_v25 = vpop.permute.xlu0 %568 }
 0x1f4   : > { %820 = vst.msk [vmem:[%s1525_s4 + $0x10] sm:$0xff] %vm564_vm2, %v580_v24  ;;  %818 = vst.msk [vmem:[%s1525_s4 + $0x8] sm:$0xff] %vm564_vm2, %v569_v25 }
 0x1f7   : > { %v585_v26 = vpop.permute.xlu1 %584  ;;  %v575_v27 = vpop.permute.xlu0 %574 }
 0x1f8   : > { %821 = vst.msk [vmem:[%s392_s16 + $0x10] sm:$0xff] %vm564_vm2, %v585_v26  ;;  %819 = vst.msk [vmem:[%s392_s16 + $0x8] sm:$0xff] %vm564_vm2, %v575_v27 }
 0x1fb   : > { %v595_v28 = vpop.permute.xlu1 %594  ;;  %v590_v29 = vpop.permute.xlu0 %589 }
 0x1fc   : > { %823 = vst.msk [vmem:[%s392_s16 + $0x18] sm:$0xff] %vm564_vm2, %v595_v28  ;;  %822 = vst.msk [vmem:[%s1525_s4 + $0x18] sm:$0xff] %vm564_vm2, %v590_v29 }
 0x1fd   : > { %1110 = shalt.err (!%p1107_p7)
}
 0x1fe   : > { %s1111_s4 = scalar_lea.hbm %s1545_s17, 512  ;;  %s1115_s16 = scalar_lea.hbm %s1638_s6, 1024 }
 0x1ff   : > { %p1112_p13 = scmp.ne.s32.totalorder %s1545_s17, %s1111_s4  ;;  %p1116_p2 = scmp.lt.u32.totalorder %s1545_s17, %s1638_s6 }
 0x200   : > { %p1117_p12 = scmp.lt.u32.totalorder %s1115_s16, %s1111_s4  ;;  %p1119_p1 = scmp.lt.u32.totalorder %s1111_s4, %s1545_s17 }
 0x201   : > { %p1113_p8 = pnand %p1112_p13, %p1668_p6 }
 0x202   : > { %p1118_p0 = por %p1117_p12, %p1116_p2 }
 0x203   : > { %p1114_p11 = pneg %p1113_p8 }
 0x204   : > { %p1120_p10 = por %p1119_p1, %p1118_p0 }
 0x206   : > { %p1121_p3 = pnand %p1120_p10, %p1114_p11 }
 0x208   : > { %1124 = shalt.err (!%p1121_p3)
}
 0x209   : > { %s1238_s20 = smov 128   ;;  %s1239_s13 = smov 8  }
 0x20a   : > { %890 = dma.vmem_to_hbm [thread:$0]  (%p1668_p6), %s1536_s10, 512, %s1545_s17, %s600_s30, %s1238_s20, %s1238_s20, %s1239_s13  }
 0x20b   : > { %s605_s27 = scalar_lea.sflag [#allocation12], %s1491_s2  ;;  %s1125_s11 = scalar_lea.vmem %s1538_s23, 512 }
 0x20c   : > { %p1126_p4 = scmp.ne.s32.totalorder %s1538_s23, %s1125_s11  ;;  %s1240_s9 = smov [#allocation11]  }
 0x20d   : > { %s1129_s15 = sshll.u32 %s1240_s9, 4  ;;  %s1130_s15 = int_to_ptr.vmem [resolvable:$false] %s1129_s15 }
 0x20e   : > { %p1127_p9 = pnand %p1126_p4, %p1668_p6  ;;  %s1131_s19 = scalar_lea.vmem %s1130_s15, 1024 }
 0x20f   : > { %p1132_p7 = scmp.lt.s32.totalorder %s1538_s23, %s1130_s15  ;;  %p1133_p13 = scmp.lt.s32.totalorder %s1131_s19, %s1125_s11 }
 0x210   : > { %p1128_p5 = pneg %p1127_p9 }
 0x211   : > { %p1134_p8 = por %p1133_p13, %p1132_p7 }
 0x213   : > { %p1135_p11 = pnand %p1134_p8, %p1128_p5 }
 0x215   : > { %1138 = shalt.err (!%p1135_p11)
}
 0x216   : > { %s1139_s10 = scalar_lea.hbm %s1550_s22, 512  ;;  %s1143_s21 = scalar_lea.hbm %s1639_s7, 1024 }
 0x217   : > { %p1140_p2 = scmp.ne.s32.totalorder %s1550_s22, %s1139_s10  ;;  %p1144_p1 = scmp.lt.u32.totalorder %s1550_s22, %s1639_s7 }
 0x218   : > { %p1145_p10 = scmp.lt.u32.totalorder %s1143_s21, %s1139_s10  ;;  %p1147_p4 = scmp.lt.u32.totalorder %s1139_s10, %s1550_s22 }
 0x219   : > { %p1141_p12 = pnand %p1140_p2, %p1668_p6 }
 0x21a   : > { %p1146_p3 = por %p1145_p10, %p1144_p1 }
 0x21b   : > { %p1142_p0 = pneg %p1141_p12 }
 0x21c   : > { %p1148_p9 = por %p1147_p4, %p1146_p3 }
 0x21e   : > { %p1149_p5 = pnand %p1148_p9, %p1142_p0 }
 0x220   : > { %1152 = shalt.err (!%p1149_p5)
}
 0x221   : > { %891 = dma.vmem_to_hbm [thread:$0]  (%p1668_p6), %s1538_s23, 512, %s1550_s22, %s605_s27, %s1238_s20, %s1238_s20, %s1239_s13  }
 0x222 PF: > { %s1669_s28 = sld [smem:[#allocation20_spill]]  ;;  %s651_s16 = sand.u32 1, %s1203_s24  }
 0x223   : > { %p1671_p13 = scmp.ge.s32.totalorder %s1223_s29, 2  ;;  %s652_s8 = scalar_lea.sflag [#allocation4], %s651_s16 }
 0x228   : > { %p1670_p7 = scmp.ne.s32.totalorder %s1669_s28, 0 }
 0x22a   : > { %p909_p8 = pnand %p1671_p13, %p1670_p7 }
 0x22c   : > { %1194 = dma.done.wait (!%p909_p8), %s652_s8, 512  }
 0x22d   : > { %1196 = vsyncadd (!%p909_p8), %s652_s8, 4294966784  ;;  %s661_s14 = scalar_lea.sflag [#allocation12], %s651_s16 }
 0x22e   : > { %1198 = dma.done.wait (!%p909_p8), %s661_s14, 512  }
 0x22f   : > { %1200 = vsyncadd (!%p909_p8), %s661_s14, 4294966784  ;;  %s31_s29 = sadd.s32 1, %s1223_s29   ;;  %s1672_s2 = sld [smem:[#allocation22_spill]] }
 0x230   : > { %p28_p11 = scmp.ge.s32.totalorder %s31_s29, 4   ;;  %s1673_s27 = sld [smem:[#allocation19_spill]] }
 0x231   : > { %s1674_s28 = sld [smem:[#allocation21_spill]]  ;;  %s1675_s24 = smov %s1207_s25 }
 0x232   : > { %s1676_s25 = smov %s1211_s26  ;;  %30 = sbr.rel (!%p28_p11) target bundleno = 14 (0xe), region = 133 }
 0x235   : > { %s1677_s26 = smov %s1672_s2 }
 0x239   :  { %666 = vsyncpa [#allocation3], 1 }
 0x23a   :  { %668 = vsyncpa [#allocation3 + $0x1], 1 }
 0x23b   :  { %669 = vsyncpa [#allocation6], 1 }
 0x23c   :  { %671 = vsyncpa [#allocation6 + $0x1], 1 }
 0x23d   :  { %672 = vsyncpa [#allocation9], 1 }
 0x23e   :  { %673 = vsyncpa [#allocation4], 1 }
 0x23f   :  { %675 = vsyncpa [#allocation4 + $0x1], 1 }
 0x240   :  { %676 = vsyncpa [#allocation12], 1 }
 0x241   :  { %678 = vsyncpa [#allocation12 + $0x1], 1 }

</bundles_post_ra>
